<compile_context>
chip_gen: v5e
topology: v5e:2x2
jax: 0.10.0
libtpu: 0.0.40
codegen_flags: <defaults>
</compile_context>

<pallas_src>
import functools
import math

import jax
import jax.numpy as jnp
from jax.experimental import pallas as pl
from jax.experimental.pallas import tpu as pltpu


def _round_up(x, m):
    return ((x + m - 1) // m) * m


def _cdiv(a, b):
    return -(-a // b)


def spectral_attention_kernel(x_ref, sc_ref, w_ref, alpha_ref, o_ref, *,
                              chunk, n_chunks):
    # x_ref:     (1, TILE_N, F)      VMEM   (input dtype, f32 or bf16)
    # sc_ref:    (1, S, TILE_N, F)   VMEM   (input dtype)
    # w_ref:     (2, F)              VMEM   (row 0 = w[:F], row 1 = w[F:], input dtype)
    # alpha_ref: (1, 1)              SMEM   (PReLU slope, f32)
    # o_ref:     (1, S, TILE_N)      VMEM   (f32)
    f32 = jnp.float32
    S = sc_ref.shape[1]
    F = sc_ref.shape[3]
    C = chunk

    w1 = w_ref[0:1, :]            # (1, F)  -- "input" half of the concat weight
    w2 = w_ref[1:2, :]            # (1, F)  -- "scattered" half
    alpha = alpha_ref[0, 0]

    # Contract the F (lane) axis of both operands: A @ B^T (flash q.k^T pattern).
    # Output lands as (1, C) with the node chunk on lanes -> no relayout needed.
    dn = (((1,), (1,)), ((), ()))
    merged = (C % 128 == 0)       # merged S-dot needs 128-aligned lane slices

    def compute_chunk(off):
        x_c = x_ref[0, pl.ds(off, C), :]                                    # (C, F)
        # x contribution, shared by every score channel: (1, C), f32 accumulate.
        s1 = jax.lax.dot_general(w1, x_c, dn, preferred_element_type=f32)

        if merged:
            # One long MXU push for all S channels: (S, C, F) -> (S*C, F).
            sc_c = sc_ref[0, :, pl.ds(off, C), :]                           # (S, C, F)
            sc_flat = sc_c.reshape(S * C, F)
            s2 = jax.lax.dot_general(w2, sc_flat, dn,
                                     preferred_element_type=f32)            # (1, S*C)
            svs = [s1 + s2[:, s * C:(s + 1) * C] for s in range(S)]
        else:
            svs = []
            for s in range(S):
                sc_s = sc_ref[0, s, pl.ds(off, C), :]                       # (C, F)
                svs.append(s1 + jax.lax.dot_general(
                    w2, sc_s, dn, preferred_element_type=f32))              # (1, C)

        # PReLU with a single shared slope (nn.PReLU default), f32 on the VPU.
        ys = [jnp.where(v >= 0.0, v, alpha * v) for v in svs]

        # Numerically-stabilized softmax over the S channels; all reductions are
        # unrolled elementwise ops on (1, C) lane-dense rows.
        m = functools.reduce(jnp.maximum, ys)
        es = [jnp.exp(y - m) for y in ys]
        denom = functools.reduce(jnp.add, es)
        inv = pl.reciprocal(denom, approx=True)                             # EUP slot

        # Direct per-channel row stores (no concatenate / sublane repack).
        for s in range(S):
            o_ref[0, s:s + 1, pl.ds(off, C)] = (es[s] * inv).astype(o_ref.dtype)

    if n_chunks == 1:
        compute_chunk(0)
    else:
        @pl.loop(0, n_chunks)
        def _(c):
            compute_chunk(pl.multiple_of(c * C, C))


def _vmem_step_bytes(tn, S, F, itemsize):
    # Double-buffered input tiles + double-buffered output tile, counting the
    # real VMEM footprint: F occupies round_up(F,128) lanes, sublanes pad to 8.
    f_pad = _round_up(F, 128)
    tn_sub = _round_up(tn, 8)
    x_tile = tn_sub * f_pad * itemsize
    sc_tile = S * tn_sub * f_pad * itemsize
    out_tile = _round_up(S, 8) * _round_up(tn, 128) * 4
    return 2 * (x_tile + sc_tile + out_tile)


def spectral_attention(x, scattered, weight_attention, prelu_alpha, *,
                       tile_n=None, lane_chunk=512):
    """x: (B, N, F); scattered: (B, S, N, F); weight_attention: (2F,).

    x / scattered may be f32 or bf16 (bf16 halves HBM traffic; the kernel is
    bandwidth bound). Output is always f32 softmax probabilities over S.
    """
    B, N, F = x.shape
    S = scattered.shape[1]
    assert scattered.shape == (B, S, N, F)
    assert weight_attention.shape == (2 * F,)
    assert scattered.dtype == x.dtype

    itemsize = jnp.dtype(x.dtype).itemsize

    # Pack both weight halves into a single (2, F) VMEM operand, matching the
    # input dtype so the MXU sees homogeneous operands.
    w = weight_attention.reshape(2, F).astype(x.dtype)
    alpha = jnp.asarray(prelu_alpha, jnp.float32).reshape(1, 1)

    # ---- generation-aware VMEM budget -------------------------------------
    try:
        cap = int(getattr(pltpu.get_tpu_info(), "vmem_capacity_bytes", 128 << 20))
    except Exception:  # be conservative if the query is unavailable
        cap = 64 << 20
    budget = max(24 << 20, min(cap - (16 << 20), 96 << 20))

    # ---- node-axis tile selection ------------------------------------------
    if tile_n is None:
        # ~2 MiB of HBM input per grid step amortizes the ~0.35 us step cost.
        per_node_hbm = max((S + 1) * F * itemsize, 1)
        tn = max(128, int((2 << 20) // per_node_hbm))
    else:
        tn = int(tile_n)

    if N <= tn:
        tn = N                                  # whole axis in one block
    else:
        tn = max(128, (tn // 128) * 128)        # lane-dense multiple of 128

    def _shrink(t):
        return max(128, ((t // 2) // 128) * 128)

    # Fit double-buffered tiles (with lane/sublane padding) in the VMEM budget.
    while tn > 128 and _vmem_step_bytes(tn, S, F, itemsize) + (6 << 20) > budget:
        tn = _shrink(tn)

    # Keep enough grid steps for pipelining / both v7x TensorCores.
    while B * _cdiv(N, tn) < 4 and tn > 128:
        tn = _shrink(tn)

    grid = (B, _cdiv(N, tn))

    # ---- in-kernel lane-chunk size (bounds live vregs) ---------------------
    C = min(int(lane_chunk), tn)
    if tn % C != 0:
        for cand in (256, 128):
            if cand <= tn and tn % cand == 0:
                C = cand
                break
        else:
            C = tn
    n_chunks = tn // C

    need = _vmem_step_bytes(tn, S, F, itemsize) + (6 << 20)
    vmem_limit = int(min(max(need, 32 << 20), cap - (2 << 20)))

    bytes_accessed = (B * N * F + B * S * N * F) * itemsize + B * S * N * 4
    flops = 2 * B * N * F * (S + 1) + 8 * B * S * N

    kernel = functools.partial(spectral_attention_kernel, chunk=C, n_chunks=n_chunks)

    return pl.pallas_call(
        kernel,
        out_shape=jax.ShapeDtypeStruct((B, S, N), jnp.float32),
        grid_spec=pltpu.PrefetchScalarGridSpec(
            num_scalar_prefetch=0,
            grid=grid,                                   # (batch, node-tiles)
            in_specs=[
                pl.BlockSpec((1, tn, F), lambda b, n: (b, n, 0)),
                pl.BlockSpec((1, S, tn, F), lambda b, n: (b, 0, n, 0)),
                pl.BlockSpec(memory_space=pltpu.MemorySpace.VMEM),   # packed weights
                pl.BlockSpec(memory_space=pltpu.MemorySpace.SMEM),   # PReLU slope
            ],
            out_specs=pl.BlockSpec((1, S, tn), lambda b, n: (b, 0, n)),
        ),
        compiler_params=pltpu.CompilerParams(
            dimension_semantics=("parallel", "parallel"),
            vmem_limit_bytes=vmem_limit,
        ),
        cost_estimate=pl.CostEstimate(
            flops=flops,
            transcendentals=B * S * N,
            bytes_accessed=bytes_accessed,
        ),
    )(x, scattered, w, alpha)


def spectral_attention_ref(x, scattered, weight_attention, prelu_alpha):
    # Pure-JAX reference mirroring the torch forward exactly (f32 throughout).
    x_e = jnp.broadcast_to(x[:, None, :, :], scattered.shape)
    cat = jnp.concatenate([x_e, scattered], axis=3)                  # (B, S, N, 2F)
    scores = jnp.einsum("bsnf,f->bsn", cat, weight_attention,
                        precision=jax.lax.Precision.HIGHEST)
    y = jnp.where(scores >= 0, scores, prelu_alpha * scores)
    return jax.nn.softmax(y, axis=1)


if __name__ == "__main__":
    B, N, in_feat, num_scores = 2, 1024, 32, 3

    key = jax.random.PRNGKey(0)
    kw, kx, ks = jax.random.split(key, 3)

    # Parameter init matching the module's reset(): uniform(-stdv, stdv), stdv=1/sqrt(2F)
    stdv = 1.0 / math.sqrt(2 * in_feat)
    weight_attention = jax.random.uniform(
        kw, (2 * in_feat,), dtype=jnp.float32, minval=-stdv, maxval=stdv)
    prelu_alpha = 0.25  # nn.PReLU() default init

    x = jax.random.normal(kx, (B, N, in_feat), dtype=jnp.float32)
    scattered = jax.random.normal(ks, (B, num_scores, N, in_feat), dtype=jnp.float32)

    ref = spectral_attention_ref(x, scattered, weight_attention, prelu_alpha)

    # tile_n=512 / lane_chunk=128 so the small demo exercises the multi-tile node
    # grid AND the in-kernel pl.loop chunk path (4 chunks per tile).
    out = spectral_attention(x, scattered, weight_attention, prelu_alpha,
                             tile_n=512, lane_chunk=128)
    out = jax.block_until_ready(out)
    assert out.shape == (B, num_scores, N)
    # Tolerance covers the MXU dot at default TPU matmul precision and the
    # approximate EUP reciprocal used for the softmax normalizer.
    assert jnp.allclose(out, ref, atol=1e-2, rtol=1e-2), "f32 mismatch vs reference"

    # bf16 inputs: half the HBM traffic on this bandwidth-bound kernel; operands
    # go straight to the MXU (no in-kernel casts), elementwise math stays f32.
    out_bf16 = spectral_attention(
        x.astype(jnp.bfloat16), scattered.astype(jnp.bfloat16),
        weight_attention, prelu_alpha, tile_n=512, lane_chunk=128)
    out_bf16 = jax.block_until_ready(out_bf16)
    assert jnp.allclose(out_bf16, ref, atol=5e-2, rtol=5e-2), "bf16 mismatch vs reference"

    print("KERNEL_OK")
</pallas_src>

<mosaic_0001>
module attributes {stable_mosaic.version = 11 : i64} {
  func.func @spectral_attention_kernel(%arg0: i32, %arg1: i32, %arg2: memref<1x512x32xf32, #tpu.memory_space<vmem>>, %arg3: memref<1x3x512x32xf32, #tpu.memory_space<vmem>>, %arg4: memref<2x32xf32, #tpu.memory_space<vmem>>, %arg5: memref<1x1xf32, #tpu.memory_space<smem>>, %arg6: memref<1x3x512xf32, #tpu.memory_space<vmem>>) attributes {dimension_semantics = [#tpu.dimension_semantics<parallel>, #tpu.dimension_semantics<parallel>], iteration_bounds = array<i64: 2, 2>, scalar_prefetch = 0 : i64, scratch_operands = 0 : i64, tpu.core_type = #tpu.core_type<tc>, window_params = [{transform_indices = @transform_0, window_bounds = array<i64: 1, 512, 32>}, {transform_indices = @transform_1, window_bounds = array<i64: 1, 3, 512, 32>}, {pipeline_mode = #tpu.pipeline_mode<synchronous>, transform_indices = @transform_2, window_bounds = array<i64: 2, 32>}, {transform_indices = @transform_3, window_bounds = array<i64: 1, 1>}, {transform_indices = @transform_4, window_bounds = array<i64: 1, 3, 512>}]} {
    %c0 = arith.constant 0 : index
    %c0_0 = arith.constant 0 : index
    %0 = vector.load %arg4[%c0, %c0_0] : memref<2x32xf32, #tpu.memory_space<vmem>>, vector<1x32xf32>
    %c1 = arith.constant 1 : index
    %c0_1 = arith.constant 0 : index
    %1 = vector.load %arg4[%c1, %c0_1] : memref<2x32xf32, #tpu.memory_space<vmem>>, vector<1x32xf32>
    %c0_2 = arith.constant 0 : index
    %c0_3 = arith.constant 0 : index
    %2 = memref.load %arg5[%c0_2, %c0_3] : memref<1x1xf32, #tpu.memory_space<smem>>
    %c0_i32 = arith.constant 0 : i32
    %c4_i32 = arith.constant 4 : i32
    %3 = arith.addi %c0_i32, %c4_i32 : i32
    %c1_i32 = arith.constant 1 : i32
    scf.for %arg7 = %c0_i32 to %3 step %c1_i32  : i32 {
      %c1_i32_5 = arith.constant 1 : i32
      %4 = arith.muli %arg7, %c1_i32_5 : i32
      %c0_i32_6 = arith.constant 0 : i32
      %5 = arith.addi %c0_i32_6, %4 : i32
      %c128_i32 = arith.constant 128 : i32
      %6 = arith.muli %5, %c128_i32 : i32
      %7 = tpu.assume_multiple %6, 128 : i32
      %c0_7 = arith.constant 0 : index
      %8 = arith.index_cast %7 : i32 to index
      %c0_8 = arith.constant 0 : index
      %9 = vector.load %arg2[%c0_7, %8, %c0_8] : memref<1x512x32xf32, #tpu.memory_space<vmem>>, vector<1x128x32xf32>
      %10 = vector.shape_cast %9 : vector<1x128x32xf32> to vector<128x32xf32>
      %cst = arith.constant dense<0.000000e+00> : vector<1x128xf32>
      %11 = tpu.matmul %0, %10, %cst {dimension_numbers = #tpu.dot_dimension_numbers<[1], [1], [0], [0], [0, 0, 1, 0], [], []>} : vector<1x32xf32>, vector<128x32xf32>, vector<1x128xf32> -> vector<1x128xf32>
      %c0_9 = arith.constant 0 : index
      %c0_10 = arith.constant 0 : index
      %12 = arith.index_cast %7 : i32 to index
      %c0_11 = arith.constant 0 : index
      %13 = vector.load %arg3[%c0_9, %c0_10, %12, %c0_11] : memref<1x3x512x32xf32, #tpu.memory_space<vmem>>, vector<1x3x128x32xf32>
      %14 = vector.shape_cast %13 : vector<1x3x128x32xf32> to vector<3x128x32xf32>
      %15 = vector.shape_cast %14 : vector<3x128x32xf32> to vector<384x32xf32>
      %cst_12 = arith.constant dense<0.000000e+00> : vector<1x384xf32>
      %16 = tpu.matmul %1, %15, %cst_12 {dimension_numbers = #tpu.dot_dimension_numbers<[1], [1], [0], [0], [0, 0, 1, 0], [], []>} : vector<1x32xf32>, vector<384x32xf32>, vector<1x384xf32> -> vector<1x384xf32>
      %17 = vector.extract_strided_slice %16 {offsets = [0, 0], sizes = [1, 128], strides = [1, 1]} : vector<1x384xf32> to vector<1x128xf32>
      %18 = arith.addf %11, %17 : vector<1x128xf32>
      %19 = vector.extract_strided_slice %16 {offsets = [0, 128], sizes = [1, 128], strides = [1, 1]} : vector<1x384xf32> to vector<1x128xf32>
      %20 = arith.addf %11, %19 : vector<1x128xf32>
      %21 = vector.extract_strided_slice %16 {offsets = [0, 256], sizes = [1, 128], strides = [1, 1]} : vector<1x384xf32> to vector<1x128xf32>
      %22 = arith.addf %11, %21 : vector<1x128xf32>
      %cst_13 = arith.constant 0.000000e+00 : f32
      %23 = vector.broadcast %cst_13 : f32 to vector<1x128xf32>
      %24 = arith.cmpf oge, %18, %23 : vector<1x128xf32>
      %25 = vector.broadcast %2 : f32 to vector<1x128xf32>
      %26 = arith.mulf %25, %18 : vector<1x128xf32>
      %27 = arith.select %24, %18, %26 : vector<1x128xi1>, vector<1x128xf32>
      %cst_14 = arith.constant 0.000000e+00 : f32
      %28 = vector.broadcast %cst_14 : f32 to vector<1x128xf32>
      %29 = arith.cmpf oge, %20, %28 : vector<1x128xf32>
      %30 = vector.broadcast %2 : f32 to vector<1x128xf32>
      %31 = arith.mulf %30, %20 : vector<1x128xf32>
      %32 = arith.select %29, %20, %31 : vector<1x128xi1>, vector<1x128xf32>
      %cst_15 = arith.constant 0.000000e+00 : f32
      %33 = vector.broadcast %cst_15 : f32 to vector<1x128xf32>
      %34 = arith.cmpf oge, %22, %33 : vector<1x128xf32>
      %35 = vector.broadcast %2 : f32 to vector<1x128xf32>
      %36 = arith.mulf %35, %22 : vector<1x128xf32>
      %37 = arith.select %34, %22, %36 : vector<1x128xi1>, vector<1x128xf32>
      %38 = arith.maximumf %27, %32 : vector<1x128xf32>
      %39 = arith.maximumf %38, %37 : vector<1x128xf32>
      %40 = arith.subf %27, %39 : vector<1x128xf32>
      %41 = math.exp %40 : vector<1x128xf32>
      %42 = arith.subf %32, %39 : vector<1x128xf32>
      %43 = math.exp %42 : vector<1x128xf32>
      %44 = arith.subf %37, %39 : vector<1x128xf32>
      %45 = math.exp %44 : vector<1x128xf32>
      %46 = arith.addf %41, %43 : vector<1x128xf32>
      %47 = arith.addf %46, %45 : vector<1x128xf32>
      %48 = tpu.reciprocal %47 {approx = true} : vector<1x128xf32> -> vector<1x128xf32>
      %49 = arith.mulf %41, %48 : vector<1x128xf32>
      %c0_16 = arith.constant 0 : index
      %c0_17 = arith.constant 0 : index
      %50 = arith.index_cast %7 : i32 to index
      %51 = vector.load %arg6[%c0_16, %c0_17, %50] : memref<1x3x512xf32, #tpu.memory_space<vmem>>, vector<1x1x128xf32>
      %52 = vector.shape_cast %51 : vector<1x1x128xf32> to vector<1x128xf32>
      %53 = vector.shape_cast %49 : vector<1x128xf32> to vector<1x1x128xf32>
      tpu.vector_store %arg6[%c0_16, %c0_17, %50], %53 {strides = array<i32>} : memref<1x3x512xf32, #tpu.memory_space<vmem>>, vector<1x1x128xf32>,
      %54 = arith.mulf %43, %48 : vector<1x128xf32>
      %c0_18 = arith.constant 0 : index
      %c1_19 = arith.constant 1 : index
      %55 = arith.index_cast %7 : i32 to index
      %56 = vector.load %arg6[%c0_18, %c1_19, %55] : memref<1x3x512xf32, #tpu.memory_space<vmem>>, vector<1x1x128xf32>
      %57 = vector.shape_cast %56 : vector<1x1x128xf32> to vector<1x128xf32>
      %58 = vector.shape_cast %54 : vector<1x128xf32> to vector<1x1x128xf32>
      tpu.vector_store %arg6[%c0_18, %c1_19, %55], %58 {strides = array<i32>} : memref<1x3x512xf32, #tpu.memory_space<vmem>>, vector<1x1x128xf32>,
      %59 = arith.mulf %45, %48 : vector<1x128xf32>
      %c0_20 = arith.constant 0 : index
      %c2 = arith.constant 2 : index
      %60 = arith.index_cast %7 : i32 to index
      %61 = vector.load %arg6[%c0_20, %c2, %60] : memref<1x3x512xf32, #tpu.memory_space<vmem>>, vector<1x1x128xf32>
      %62 = vector.shape_cast %61 : vector<1x1x128xf32> to vector<1x128xf32>
      %63 = vector.shape_cast %59 : vector<1x128xf32> to vector<1x1x128xf32>
      tpu.vector_store %arg6[%c0_20, %c2, %60], %63 {strides = array<i32>} : memref<1x3x512xf32, #tpu.memory_space<vmem>>, vector<1x1x128xf32>,
    }
    %c4_i32_4 = arith.constant 4 : i32
    return
  }
  func.func @transform_0(%arg0: i32, %arg1: i32) -> (i32, i32, i32) {
    %c0_i32 = arith.constant 0 : i32
    %c0_i32_0 = arith.constant 0 : i32
    return %arg0, %arg1, %c0_i32 : i32, i32, i32
  }
  func.func @transform_1(%arg0: i32, %arg1: i32) -> (i32, i32, i32, i32) {
    %c0_i32 = arith.constant 0 : i32
    %c0_i32_0 = arith.constant 0 : i32
    %c0_i32_1 = arith.constant 0 : i32
    return %arg0, %c0_i32, %arg1, %c0_i32_0 : i32, i32, i32, i32
  }
  func.func @transform_2(%arg0: i32, %arg1: i32) -> (i32, i32) {
    %c0_i32 = arith.constant 0 : i32
    %c0_i32_0 = arith.constant 0 : i32
    %c0_i32_1 = arith.constant 0 : i32
    return %c0_i32, %c0_i32_0 : i32, i32
  }
  func.func @transform_3(%arg0: i32, %arg1: i32) -> (i32, i32) {
    %c0_i32 = arith.constant 0 : i32
    %c0_i32_0 = arith.constant 0 : i32
    %c0_i32_1 = arith.constant 0 : i32
    return %c0_i32, %c0_i32_0 : i32, i32
  }
  func.func @transform_4(%arg0: i32, %arg1: i32) -> (i32, i32, i32) {
    %c0_i32 = arith.constant 0 : i32
    %c0_i32_0 = arith.constant 0 : i32
    return %arg0, %c0_i32, %arg1 : i32, i32, i32
  }
}

</mosaic_0001>

<bundles_post_ra>
// kernel: tpu_custom_call.1
= control target key start
LH: loop header
LB: loop body
LE: loop exit
PB: predicated region body
PF: predicated region fallthrough
CT: control target
= control target key end

     0   :  { %s2489_s0 = inlined_call_operand.vmem [shape: f32[2,1024,32], index: 0, kind: input, shape index: {}]   ;;  %s2490_s1 = inlined_call_operand.vmem [shape: f32[2,3,1024,32], index: 1, kind: input, shape index: {}]   ;;  %s2491_s2 = inlined_call_operand.vmem [shape: f32[2,32], index: 2, kind: input, shape index: {}]   ;;  %s2492_s3 = inlined_call_operand.<no memory space> [shape: f32[1,1], index: 3, kind: input, shape index: {}]   ;;  %s2493_s4 = inlined_call_operand.vmem [shape: f32[2,3,1024], index: 4, kind: output, shape index: {}]  }
   0x1   :  { %9 = sst [smem:[#allocation2]] %s2492_s3 }
   0x2   :  { %s1829_s17 = smov 0   ;;  %s1831_s18 = smov 0  }
   0x3   :  { %s1833_s19 = smov 0   ;;  %s1835_s20 = smov 0  }
   0x4   :  { %s1837_s21 = smov 0   ;;  %s1839_s22 = smov 0  }
   0x5   :  { %s1841_s23 = smov 0  }
   0x6 LB: > { %s24_s3 = sadd.s32 1, %s1787_s21  ;;  %s27_s24 = sadd.s32 1, %s1791_s22  ;;  %s1795_s23 = sphi %s1841_s23, %s15_s23   ;;  %s1791_s22 = sphi %s1839_s22, %s2499_s22   ;;  %s1787_s21 = sphi %s1837_s21, %s2498_s21   ;;  %s1783_s20 = sphi %s1835_s20, %s2497_s20   ;;  %s1779_s19 = sphi %s1833_s19, %s2496_s19   ;;  %s1775_s18 = sphi %s1831_s18, %s2495_s18   ;;  %s1771_s17 = sphi %s1829_s17, %s2494_s17  }
   0x7   : > { %p25_p0 = scmp.ge.s32.totalorder %s24_s3, 2  ;;  %p71_p1 = scmp.ne.s32.totalorder %s1775_s18, %s1771_s17 }
   0x8   : > { %p72_p2 = scmp.eq.s32.totalorder %s1795_s23, 0  ;;  %s64_s28 = sadd.s32 1, %s1775_s18 }
   0x9   : > { %s2501_s3 = smov (%p25_p0, %s24_s3), 0  ;;  %s2503_s24 = smov (!%p25_p0, %s27_s24), %s1791_s22 }
   0xa   : > { %p73_p3 = por %p72_p2, %p71_p1  ;;  %p29_p4 = scmp.ge.s32.totalorder %s2503_s24, 2 }
   0xb   : > { %s60_s25 = ssub.s32 %s1787_s21, %s2501_s3  ;;  %p1580_p6 = scmp.ge.s32.totalorder %s1795_s23, 4 }
   0xc   : > { %s2505_s24 = smov (%p29_p4, %s2503_s24), 0 }
   0xd   : > { %s59_s26 = ssub.s32 %s1791_s22, %s2505_s24  ;;  %173 = sbr.rel (%p1580_p6) target bundleno = 218 (0xda), region = 24 }
   0xe   : > { %s61_s27 = sor.u32 %s60_s25, %s59_s26 }
   0xf   : > { %p62_p5 = scmp.eq.s32.totalorder %s61_s27, 0 }
  0x11   : > { %s1880_s29 = scalar_select %p62_p5, %s1775_s18, %s64_s28  }
  0x12   : > { %189 = sbr.rel (!%p73_p3) target bundleno = 218 (0xda), region = 32  ;;  %s191_s30 = sand.u32 (%p73_p3), 1, %s1775_s18  }
  0x13   : > { %s1662_s5 = smul.u32 (%p73_p3), 1536, %s191_s30  ;;  %s1581_s6 = sshll.u32 (%p73_p3), %s1787_s21, 6 }
  0x14   : > { %s1663_s7 = smul.u32 (%p73_p3), 384, %s1791_s22 }
  0x15   : > { %s1894_s13 = scalar_lea.vmem (%p73_p3), [#allocation3], %s1662_s5 }
  0x16   : > { %s196_s8 = sadd.s32 (%p73_p3), %s1663_s7, %s1581_s6 }
  0x17   : > { %s1582_s9 = sshll.u32 %s196_s8, 3 }
  0x18   : > { %s1889_s12 = scalar_lea.vmem %s2490_s1, %s1582_s9 }
  0x19   : > { %v609_v0 = vld [vmem:[%s1889_s12] sm:$0xff]  ;;  %v611_v1 = vld [vmem:[%s1889_s12 + $0x8] sm:$0xff]  ;;  %v613_v2 = vld [vmem:[%s1889_s12 + $0x10] sm:$0xff] }
  0x1a   : > { %610 = vst [vmem:[%s1894_s13] sm:$0xff] %v609_v0  ;;  %v615_v3 = vld [vmem:[%s1889_s12 + $0x18] sm:$0xff]  ;;  %v617_v4 = vld [vmem:[%s1889_s12 + $0x20] sm:$0xff]  ;;  %v619_v5 = vld [vmem:[%s1889_s12 + $0x28] sm:$0xff] }
  0x1b   : > { %612 = vst [vmem:[%s1894_s13 + $0x8] sm:$0xff] %v611_v1  ;;  %v621_v6 = vld [vmem:[%s1889_s12 + $0x30] sm:$0xff]  ;;  %v623_v7 = vld [vmem:[%s1889_s12 + $0x38] sm:$0xff]  ;;  %v625_v8 = vld [vmem:[%s1889_s12 + $0x40] sm:$0xff] }
  0x1c   : > { %614 = vst [vmem:[%s1894_s13 + $0x10] sm:$0xff] %v613_v2  ;;  %v627_v9 = vld [vmem:[%s1889_s12 + $0x48] sm:$0xff]  ;;  %v629_v10 = vld [vmem:[%s1889_s12 + $0x50] sm:$0xff]  ;;  %v631_v11 = vld [vmem:[%s1889_s12 + $0x58] sm:$0xff] }
  0x1d   : > { %616 = vst [vmem:[%s1894_s13 + $0x18] sm:$0xff] %v615_v3  ;;  %v633_v12 = vld [vmem:[%s1889_s12 + $0x60] sm:$0xff]  ;;  %v635_v13 = vld [vmem:[%s1889_s12 + $0x68] sm:$0xff]  ;;  %v637_v14 = vld [vmem:[%s1889_s12 + $0x70] sm:$0xff] }
  0x1e   : > { %618 = vst [vmem:[%s1894_s13 + $0x20] sm:$0xff] %v617_v4  ;;  %v639_v15 = vld [vmem:[%s1889_s12 + $0x78] sm:$0xff]  ;;  %v641_v16 = vld [vmem:[%s1889_s12 + $0x80] sm:$0xff]  ;;  %v643_v17 = vld [vmem:[%s1889_s12 + $0x88] sm:$0xff] }
  0x1f   : > { %620 = vst [vmem:[%s1894_s13 + $0x28] sm:$0xff] %v619_v5  ;;  %v645_v18 = vld [vmem:[%s1889_s12 + $0x90] sm:$0xff]  ;;  %v647_v19 = vld [vmem:[%s1889_s12 + $0x98] sm:$0xff]  ;;  %v649_v20 = vld [vmem:[%s1889_s12 + $0xa0] sm:$0xff] }
  0x20   : > { %622 = vst [vmem:[%s1894_s13 + $0x30] sm:$0xff] %v621_v6  ;;  %v651_v21 = vld [vmem:[%s1889_s12 + $0xa8] sm:$0xff]  ;;  %v653_v22 = vld [vmem:[%s1889_s12 + $0xb0] sm:$0xff]  ;;  %v655_v23 = vld [vmem:[%s1889_s12 + $0xb8] sm:$0xff] }
  0x21   : > { %624 = vst [vmem:[%s1894_s13 + $0x38] sm:$0xff] %v623_v7  ;;  %v657_v24 = vld [vmem:[%s1889_s12 + $0xc0] sm:$0xff]  ;;  %v659_v25 = vld [vmem:[%s1889_s12 + $0xc8] sm:$0xff]  ;;  %v661_v26 = vld [vmem:[%s1889_s12 + $0xd0] sm:$0xff] }
  0x22   : > { %626 = vst [vmem:[%s1894_s13 + $0x40] sm:$0xff] %v625_v8  ;;  %v663_v27 = vld [vmem:[%s1889_s12 + $0xd8] sm:$0xff]  ;;  %v665_v28 = vld [vmem:[%s1889_s12 + $0xe0] sm:$0xff]  ;;  %v667_v29 = vld [vmem:[%s1889_s12 + $0xe8] sm:$0xff] }
  0x23   : > { %628 = vst [vmem:[%s1894_s13 + $0x48] sm:$0xff] %v627_v9  ;;  %v669_v30 = vld [vmem:[%s1889_s12 + $0xf0] sm:$0xff]  ;;  %v671_v31 = vld [vmem:[%s1889_s12 + $0xf8] sm:$0xff]  ;;  %v673_v32 = vld [vmem:[%s1889_s12 + $0x100] sm:$0xff] }
  0x24   : > { %630 = vst [vmem:[%s1894_s13 + $0x50] sm:$0xff] %v629_v10  ;;  %v675_v33 = vld [vmem:[%s1889_s12 + $0x108] sm:$0xff]  ;;  %v677_v34 = vld [vmem:[%s1889_s12 + $0x110] sm:$0xff]  ;;  %v679_v35 = vld [vmem:[%s1889_s12 + $0x118] sm:$0xff] }
  0x25   : > { %632 = vst [vmem:[%s1894_s13 + $0x58] sm:$0xff] %v631_v11  ;;  %v681_v36 = vld [vmem:[%s1889_s12 + $0x120] sm:$0xff]  ;;  %v683_v37 = vld [vmem:[%s1889_s12 + $0x128] sm:$0xff]  ;;  %v685_v38 = vld [vmem:[%s1889_s12 + $0x130] sm:$0xff] }
  0x26   : > { %634 = vst [vmem:[%s1894_s13 + $0x60] sm:$0xff] %v633_v12  ;;  %v687_v39 = vld [vmem:[%s1889_s12 + $0x138] sm:$0xff]  ;;  %v689_v40 = vld [vmem:[%s1889_s12 + $0x140] sm:$0xff]  ;;  %v691_v41 = vld [vmem:[%s1889_s12 + $0x148] sm:$0xff] }
  0x27   : > { %636 = vst [vmem:[%s1894_s13 + $0x68] sm:$0xff] %v635_v13  ;;  %v693_v42 = vld [vmem:[%s1889_s12 + $0x150] sm:$0xff]  ;;  %v695_v43 = vld [vmem:[%s1889_s12 + $0x158] sm:$0xff]  ;;  %v697_v44 = vld [vmem:[%s1889_s12 + $0x160] sm:$0xff] }
  0x28   : > { %638 = vst [vmem:[%s1894_s13 + $0x70] sm:$0xff] %v637_v14  ;;  %v699_v45 = vld [vmem:[%s1889_s12 + $0x168] sm:$0xff]  ;;  %v701_v46 = vld [vmem:[%s1889_s12 + $0x170] sm:$0xff]  ;;  %v703_v47 = vld [vmem:[%s1889_s12 + $0x178] sm:$0xff] }
  0x29   : > { %640 = vst [vmem:[%s1894_s13 + $0x78] sm:$0xff] %v639_v15  ;;  %v705_v48 = vld [vmem:[%s1889_s12 + $0x180] sm:$0xff]  ;;  %v707_v49 = vld [vmem:[%s1889_s12 + $0x188] sm:$0xff]  ;;  %v709_v50 = vld [vmem:[%s1889_s12 + $0x190] sm:$0xff] }
  0x2a   : > { %642 = vst [vmem:[%s1894_s13 + $0x80] sm:$0xff] %v641_v16  ;;  %v711_v51 = vld [vmem:[%s1889_s12 + $0x198] sm:$0xff]  ;;  %v713_v52 = vld [vmem:[%s1889_s12 + $0x1a0] sm:$0xff]  ;;  %v715_v53 = vld [vmem:[%s1889_s12 + $0x1a8] sm:$0xff] }
  0x2b   : > { %644 = vst [vmem:[%s1894_s13 + $0x88] sm:$0xff] %v643_v17  ;;  %v717_v54 = vld [vmem:[%s1889_s12 + $0x1b0] sm:$0xff]  ;;  %v719_v55 = vld [vmem:[%s1889_s12 + $0x1b8] sm:$0xff]  ;;  %v721_v56 = vld [vmem:[%s1889_s12 + $0x1c0] sm:$0xff] }
  0x2c   : > { %646 = vst [vmem:[%s1894_s13 + $0x90] sm:$0xff] %v645_v18  ;;  %v723_v57 = vld [vmem:[%s1889_s12 + $0x1c8] sm:$0xff]  ;;  %v725_v58 = vld [vmem:[%s1889_s12 + $0x1d0] sm:$0xff]  ;;  %v727_v59 = vld [vmem:[%s1889_s12 + $0x1d8] sm:$0xff] }
  0x2d   : > { %648 = vst [vmem:[%s1894_s13 + $0x98] sm:$0xff] %v647_v19  ;;  %v729_v60 = vld [vmem:[%s1889_s12 + $0x1e0] sm:$0xff]  ;;  %v731_v61 = vld [vmem:[%s1889_s12 + $0x1e8] sm:$0xff]  ;;  %v733_v62 = vld [vmem:[%s1889_s12 + $0x1f0] sm:$0xff] }
  0x2e   : > { %650 = vst [vmem:[%s1894_s13 + $0xa0] sm:$0xff] %v649_v20  ;;  %v735_v63 = vld [vmem:[%s1889_s12 + $0x1f8] sm:$0xff]  ;;  %v737_v0 = vld [vmem:[%s1889_s12 + $0x400] sm:$0xff]  ;;  %v739_v1 = vld [vmem:[%s1889_s12 + $0x408] sm:$0xff] }
  0x2f   : > { %652 = vst [vmem:[%s1894_s13 + $0xa8] sm:$0xff] %v651_v21  ;;  %v741_v2 = vld [vmem:[%s1889_s12 + $0x410] sm:$0xff]  ;;  %v743_v3 = vld [vmem:[%s1889_s12 + $0x418] sm:$0xff]  ;;  %v745_v4 = vld [vmem:[%s1889_s12 + $0x420] sm:$0xff] }
  0x30   : > { %654 = vst [vmem:[%s1894_s13 + $0xb0] sm:$0xff] %v653_v22  ;;  %v747_v5 = vld [vmem:[%s1889_s12 + $0x428] sm:$0xff]  ;;  %v749_v6 = vld [vmem:[%s1889_s12 + $0x430] sm:$0xff]  ;;  %v751_v7 = vld [vmem:[%s1889_s12 + $0x438] sm:$0xff] }
  0x31   : > { %656 = vst [vmem:[%s1894_s13 + $0xb8] sm:$0xff] %v655_v23  ;;  %v753_v8 = vld [vmem:[%s1889_s12 + $0x440] sm:$0xff]  ;;  %v755_v9 = vld [vmem:[%s1889_s12 + $0x448] sm:$0xff]  ;;  %v757_v10 = vld [vmem:[%s1889_s12 + $0x450] sm:$0xff] }
  0x32   : > { %658 = vst [vmem:[%s1894_s13 + $0xc0] sm:$0xff] %v657_v24  ;;  %v759_v11 = vld [vmem:[%s1889_s12 + $0x458] sm:$0xff]  ;;  %v761_v12 = vld [vmem:[%s1889_s12 + $0x460] sm:$0xff]  ;;  %v763_v13 = vld [vmem:[%s1889_s12 + $0x468] sm:$0xff] }
  0x33   : > { %660 = vst [vmem:[%s1894_s13 + $0xc8] sm:$0xff] %v659_v25  ;;  %v765_v14 = vld [vmem:[%s1889_s12 + $0x470] sm:$0xff]  ;;  %v767_v15 = vld [vmem:[%s1889_s12 + $0x478] sm:$0xff]  ;;  %v769_v16 = vld [vmem:[%s1889_s12 + $0x480] sm:$0xff] }
  0x34   : > { %662 = vst [vmem:[%s1894_s13 + $0xd0] sm:$0xff] %v661_v26  ;;  %v771_v17 = vld [vmem:[%s1889_s12 + $0x488] sm:$0xff]  ;;  %v773_v18 = vld [vmem:[%s1889_s12 + $0x490] sm:$0xff]  ;;  %v775_v19 = vld [vmem:[%s1889_s12 + $0x498] sm:$0xff] }
  0x35   : > { %664 = vst [vmem:[%s1894_s13 + $0xd8] sm:$0xff] %v663_v27  ;;  %v777_v20 = vld [vmem:[%s1889_s12 + $0x4a0] sm:$0xff]  ;;  %v779_v21 = vld [vmem:[%s1889_s12 + $0x4a8] sm:$0xff]  ;;  %v781_v22 = vld [vmem:[%s1889_s12 + $0x4b0] sm:$0xff] }
  0x36   : > { %666 = vst [vmem:[%s1894_s13 + $0xe0] sm:$0xff] %v665_v28  ;;  %v783_v23 = vld [vmem:[%s1889_s12 + $0x4b8] sm:$0xff]  ;;  %v785_v24 = vld [vmem:[%s1889_s12 + $0x4c0] sm:$0xff]  ;;  %v787_v25 = vld [vmem:[%s1889_s12 + $0x4c8] sm:$0xff] }
  0x37   : > { %668 = vst [vmem:[%s1894_s13 + $0xe8] sm:$0xff] %v667_v29  ;;  %v789_v26 = vld [vmem:[%s1889_s12 + $0x4d0] sm:$0xff]  ;;  %v791_v27 = vld [vmem:[%s1889_s12 + $0x4d8] sm:$0xff]  ;;  %v793_v28 = vld [vmem:[%s1889_s12 + $0x4e0] sm:$0xff] }
  0x38   : > { %670 = vst [vmem:[%s1894_s13 + $0xf0] sm:$0xff] %v669_v30  ;;  %v795_v29 = vld [vmem:[%s1889_s12 + $0x4e8] sm:$0xff]  ;;  %v797_v30 = vld [vmem:[%s1889_s12 + $0x4f0] sm:$0xff] }
  0x39   : > { %672 = vst [vmem:[%s1894_s13 + $0xf8] sm:$0xff] %v671_v31  ;;  %v799_v31 = vld [vmem:[%s1889_s12 + $0x4f8] sm:$0xff] }
  0x3a   : > { %674 = vst [vmem:[%s1894_s13 + $0x100] sm:$0xff] %v673_v32  ;;  %v801_v32 = vld [vmem:[%s1889_s12 + $0x500] sm:$0xff] }
  0x3b   : > { %676 = vst [vmem:[%s1894_s13 + $0x108] sm:$0xff] %v675_v33  ;;  %v803_v33 = vld [vmem:[%s1889_s12 + $0x508] sm:$0xff] }
  0x3c   : > { %678 = vst [vmem:[%s1894_s13 + $0x110] sm:$0xff] %v677_v34  ;;  %v805_v34 = vld [vmem:[%s1889_s12 + $0x510] sm:$0xff] }
  0x3d   : > { %680 = vst [vmem:[%s1894_s13 + $0x118] sm:$0xff] %v679_v35  ;;  %v807_v35 = vld [vmem:[%s1889_s12 + $0x518] sm:$0xff] }
  0x3e   : > { %682 = vst [vmem:[%s1894_s13 + $0x120] sm:$0xff] %v681_v36  ;;  %v809_v36 = vld [vmem:[%s1889_s12 + $0x520] sm:$0xff] }
  0x3f   : > { %684 = vst [vmem:[%s1894_s13 + $0x128] sm:$0xff] %v683_v37  ;;  %v811_v37 = vld [vmem:[%s1889_s12 + $0x528] sm:$0xff] }
  0x40   : > { %686 = vst [vmem:[%s1894_s13 + $0x130] sm:$0xff] %v685_v38  ;;  %v813_v38 = vld [vmem:[%s1889_s12 + $0x530] sm:$0xff] }
  0x41   : > { %688 = vst [vmem:[%s1894_s13 + $0x138] sm:$0xff] %v687_v39  ;;  %v815_v39 = vld [vmem:[%s1889_s12 + $0x538] sm:$0xff] }
  0x42   : > { %690 = vst [vmem:[%s1894_s13 + $0x140] sm:$0xff] %v689_v40  ;;  %v817_v40 = vld [vmem:[%s1889_s12 + $0x540] sm:$0xff] }
  0x43   : > { %692 = vst [vmem:[%s1894_s13 + $0x148] sm:$0xff] %v691_v41  ;;  %v819_v41 = vld [vmem:[%s1889_s12 + $0x548] sm:$0xff] }
  0x44   : > { %694 = vst [vmem:[%s1894_s13 + $0x150] sm:$0xff] %v693_v42  ;;  %v821_v42 = vld [vmem:[%s1889_s12 + $0x550] sm:$0xff] }
  0x45   : > { %696 = vst [vmem:[%s1894_s13 + $0x158] sm:$0xff] %v695_v43  ;;  %v823_v43 = vld [vmem:[%s1889_s12 + $0x558] sm:$0xff] }
  0x46   : > { %698 = vst [vmem:[%s1894_s13 + $0x160] sm:$0xff] %v697_v44  ;;  %v825_v44 = vld [vmem:[%s1889_s12 + $0x560] sm:$0xff] }
  0x47   : > { %700 = vst [vmem:[%s1894_s13 + $0x168] sm:$0xff] %v699_v45  ;;  %v827_v45 = vld [vmem:[%s1889_s12 + $0x568] sm:$0xff] }
  0x48   : > { %702 = vst [vmem:[%s1894_s13 + $0x170] sm:$0xff] %v701_v46  ;;  %v829_v46 = vld [vmem:[%s1889_s12 + $0x570] sm:$0xff] }
  0x49   : > { %704 = vst [vmem:[%s1894_s13 + $0x178] sm:$0xff] %v703_v47  ;;  %v831_v47 = vld [vmem:[%s1889_s12 + $0x578] sm:$0xff] }
  0x4a   : > { %706 = vst [vmem:[%s1894_s13 + $0x180] sm:$0xff] %v705_v48  ;;  %v833_v48 = vld [vmem:[%s1889_s12 + $0x580] sm:$0xff] }
  0x4b   : > { %708 = vst [vmem:[%s1894_s13 + $0x188] sm:$0xff] %v707_v49  ;;  %v835_v49 = vld [vmem:[%s1889_s12 + $0x588] sm:$0xff] }
  0x4c   : > { %710 = vst [vmem:[%s1894_s13 + $0x190] sm:$0xff] %v709_v50  ;;  %v837_v50 = vld [vmem:[%s1889_s12 + $0x590] sm:$0xff] }
  0x4d   : > { %712 = vst [vmem:[%s1894_s13 + $0x198] sm:$0xff] %v711_v51  ;;  %v839_v51 = vld [vmem:[%s1889_s12 + $0x598] sm:$0xff] }
  0x4e   : > { %714 = vst [vmem:[%s1894_s13 + $0x1a0] sm:$0xff] %v713_v52  ;;  %v841_v52 = vld [vmem:[%s1889_s12 + $0x5a0] sm:$0xff] }
  0x4f   : > { %716 = vst [vmem:[%s1894_s13 + $0x1a8] sm:$0xff] %v715_v53  ;;  %v843_v53 = vld [vmem:[%s1889_s12 + $0x5a8] sm:$0xff] }
  0x50   : > { %718 = vst [vmem:[%s1894_s13 + $0x1b0] sm:$0xff] %v717_v54  ;;  %v845_v54 = vld [vmem:[%s1889_s12 + $0x5b0] sm:$0xff] }
  0x51   : > { %720 = vst [vmem:[%s1894_s13 + $0x1b8] sm:$0xff] %v719_v55  ;;  %v847_v55 = vld [vmem:[%s1889_s12 + $0x5b8] sm:$0xff] }
  0x52   : > { %722 = vst [vmem:[%s1894_s13 + $0x1c0] sm:$0xff] %v721_v56  ;;  %v849_v56 = vld [vmem:[%s1889_s12 + $0x5c0] sm:$0xff] }
  0x53   : > { %724 = vst [vmem:[%s1894_s13 + $0x1c8] sm:$0xff] %v723_v57  ;;  %v851_v57 = vld [vmem:[%s1889_s12 + $0x5c8] sm:$0xff] }
  0x54   : > { %726 = vst [vmem:[%s1894_s13 + $0x1d0] sm:$0xff] %v725_v58  ;;  %v853_v58 = vld [vmem:[%s1889_s12 + $0x5d0] sm:$0xff] }
  0x55   : > { %728 = vst [vmem:[%s1894_s13 + $0x1d8] sm:$0xff] %v727_v59  ;;  %v855_v59 = vld [vmem:[%s1889_s12 + $0x5d8] sm:$0xff] }
  0x56   : > { %730 = vst [vmem:[%s1894_s13 + $0x1e0] sm:$0xff] %v729_v60  ;;  %v857_v60 = vld [vmem:[%s1889_s12 + $0x5e0] sm:$0xff] }
  0x57   : > { %732 = vst [vmem:[%s1894_s13 + $0x1e8] sm:$0xff] %v731_v61  ;;  %v859_v61 = vld [vmem:[%s1889_s12 + $0x5e8] sm:$0xff] }
  0x58   : > { %734 = vst [vmem:[%s1894_s13 + $0x1f0] sm:$0xff] %v733_v62  ;;  %v861_v62 = vld [vmem:[%s1889_s12 + $0x5f0] sm:$0xff] }
  0x59   : > { %736 = vst [vmem:[%s1894_s13 + $0x1f8] sm:$0xff] %v735_v63  ;;  %v863_v63 = vld [vmem:[%s1889_s12 + $0x5f8] sm:$0xff] }
  0x5a   : > { %738 = vst [vmem:[%s1894_s13 + $0x200] sm:$0xff] %v737_v0  ;;  %v865_v0 = vld [vmem:[%s1889_s12 + $0x800] sm:$0xff] }
  0x5b   : > { %740 = vst [vmem:[%s1894_s13 + $0x208] sm:$0xff] %v739_v1  ;;  %v867_v1 = vld [vmem:[%s1889_s12 + $0x808] sm:$0xff] }
  0x5c   : > { %742 = vst [vmem:[%s1894_s13 + $0x210] sm:$0xff] %v741_v2  ;;  %v869_v2 = vld [vmem:[%s1889_s12 + $0x810] sm:$0xff] }
  0x5d   : > { %744 = vst [vmem:[%s1894_s13 + $0x218] sm:$0xff] %v743_v3  ;;  %v871_v3 = vld [vmem:[%s1889_s12 + $0x818] sm:$0xff] }
  0x5e   : > { %746 = vst [vmem:[%s1894_s13 + $0x220] sm:$0xff] %v745_v4  ;;  %v873_v4 = vld [vmem:[%s1889_s12 + $0x820] sm:$0xff] }
  0x5f   : > { %748 = vst [vmem:[%s1894_s13 + $0x228] sm:$0xff] %v747_v5  ;;  %v875_v5 = vld [vmem:[%s1889_s12 + $0x828] sm:$0xff] }
  0x60   : > { %750 = vst [vmem:[%s1894_s13 + $0x230] sm:$0xff] %v749_v6  ;;  %v877_v6 = vld [vmem:[%s1889_s12 + $0x830] sm:$0xff] }
  0x61   : > { %752 = vst [vmem:[%s1894_s13 + $0x238] sm:$0xff] %v751_v7  ;;  %v879_v7 = vld [vmem:[%s1889_s12 + $0x838] sm:$0xff] }
  0x62   : > { %754 = vst [vmem:[%s1894_s13 + $0x240] sm:$0xff] %v753_v8  ;;  %v881_v8 = vld [vmem:[%s1889_s12 + $0x840] sm:$0xff] }
  0x63   : > { %756 = vst [vmem:[%s1894_s13 + $0x248] sm:$0xff] %v755_v9  ;;  %v883_v9 = vld [vmem:[%s1889_s12 + $0x848] sm:$0xff] }
  0x64   : > { %758 = vst [vmem:[%s1894_s13 + $0x250] sm:$0xff] %v757_v10  ;;  %v885_v10 = vld [vmem:[%s1889_s12 + $0x850] sm:$0xff] }
  0x65   : > { %760 = vst [vmem:[%s1894_s13 + $0x258] sm:$0xff] %v759_v11  ;;  %v887_v11 = vld [vmem:[%s1889_s12 + $0x858] sm:$0xff] }
  0x66   : > { %762 = vst [vmem:[%s1894_s13 + $0x260] sm:$0xff] %v761_v12  ;;  %v889_v12 = vld [vmem:[%s1889_s12 + $0x860] sm:$0xff] }
  0x67   : > { %764 = vst [vmem:[%s1894_s13 + $0x268] sm:$0xff] %v763_v13  ;;  %v891_v13 = vld [vmem:[%s1889_s12 + $0x868] sm:$0xff] }
  0x68   : > { %766 = vst [vmem:[%s1894_s13 + $0x270] sm:$0xff] %v765_v14  ;;  %v893_v14 = vld [vmem:[%s1889_s12 + $0x870] sm:$0xff] }
  0x69   : > { %768 = vst [vmem:[%s1894_s13 + $0x278] sm:$0xff] %v767_v15  ;;  %v895_v15 = vld [vmem:[%s1889_s12 + $0x878] sm:$0xff] }
  0x6a   : > { %770 = vst [vmem:[%s1894_s13 + $0x280] sm:$0xff] %v769_v16  ;;  %v897_v16 = vld [vmem:[%s1889_s12 + $0x880] sm:$0xff] }
  0x6b   : > { %772 = vst [vmem:[%s1894_s13 + $0x288] sm:$0xff] %v771_v17  ;;  %v899_v17 = vld [vmem:[%s1889_s12 + $0x888] sm:$0xff] }
  0x6c   : > { %774 = vst [vmem:[%s1894_s13 + $0x290] sm:$0xff] %v773_v18  ;;  %v901_v18 = vld [vmem:[%s1889_s12 + $0x890] sm:$0xff] }
  0x6d   : > { %776 = vst [vmem:[%s1894_s13 + $0x298] sm:$0xff] %v775_v19  ;;  %v903_v19 = vld [vmem:[%s1889_s12 + $0x898] sm:$0xff] }
  0x6e   : > { %778 = vst [vmem:[%s1894_s13 + $0x2a0] sm:$0xff] %v777_v20  ;;  %v905_v20 = vld [vmem:[%s1889_s12 + $0x8a0] sm:$0xff] }
  0x6f   : > { %780 = vst [vmem:[%s1894_s13 + $0x2a8] sm:$0xff] %v779_v21  ;;  %v907_v21 = vld [vmem:[%s1889_s12 + $0x8a8] sm:$0xff] }
  0x70   : > { %782 = vst [vmem:[%s1894_s13 + $0x2b0] sm:$0xff] %v781_v22  ;;  %v909_v22 = vld [vmem:[%s1889_s12 + $0x8b0] sm:$0xff] }
  0x71   : > { %784 = vst [vmem:[%s1894_s13 + $0x2b8] sm:$0xff] %v783_v23  ;;  %v911_v23 = vld [vmem:[%s1889_s12 + $0x8b8] sm:$0xff] }
  0x72   : > { %786 = vst [vmem:[%s1894_s13 + $0x2c0] sm:$0xff] %v785_v24  ;;  %v913_v24 = vld [vmem:[%s1889_s12 + $0x8c0] sm:$0xff] }
  0x73   : > { %788 = vst [vmem:[%s1894_s13 + $0x2c8] sm:$0xff] %v787_v25  ;;  %v915_v25 = vld [vmem:[%s1889_s12 + $0x8c8] sm:$0xff] }
  0x74   : > { %790 = vst [vmem:[%s1894_s13 + $0x2d0] sm:$0xff] %v789_v26  ;;  %v917_v26 = vld [vmem:[%s1889_s12 + $0x8d0] sm:$0xff] }
  0x75   : > { %792 = vst [vmem:[%s1894_s13 + $0x2d8] sm:$0xff] %v791_v27  ;;  %v919_v27 = vld [vmem:[%s1889_s12 + $0x8d8] sm:$0xff] }
  0x76   : > { %794 = vst [vmem:[%s1894_s13 + $0x2e0] sm:$0xff] %v793_v28  ;;  %v921_v28 = vld [vmem:[%s1889_s12 + $0x8e0] sm:$0xff] }
  0x77   : > { %796 = vst [vmem:[%s1894_s13 + $0x2e8] sm:$0xff] %v795_v29  ;;  %v923_v29 = vld [vmem:[%s1889_s12 + $0x8e8] sm:$0xff] }
  0x78   : > { %798 = vst [vmem:[%s1894_s13 + $0x2f0] sm:$0xff] %v797_v30  ;;  %v925_v30 = vld [vmem:[%s1889_s12 + $0x8f0] sm:$0xff] }
  0x79   : > { %800 = vst [vmem:[%s1894_s13 + $0x2f8] sm:$0xff] %v799_v31  ;;  %v927_v31 = vld [vmem:[%s1889_s12 + $0x8f8] sm:$0xff] }
  0x7a   : > { %802 = vst [vmem:[%s1894_s13 + $0x300] sm:$0xff] %v801_v32  ;;  %v929_v32 = vld [vmem:[%s1889_s12 + $0x900] sm:$0xff] }
  0x7b   : > { %804 = vst [vmem:[%s1894_s13 + $0x308] sm:$0xff] %v803_v33  ;;  %v931_v33 = vld [vmem:[%s1889_s12 + $0x908] sm:$0xff] }
  0x7c   : > { %806 = vst [vmem:[%s1894_s13 + $0x310] sm:$0xff] %v805_v34  ;;  %v933_v34 = vld [vmem:[%s1889_s12 + $0x910] sm:$0xff] }
  0x7d   : > { %808 = vst [vmem:[%s1894_s13 + $0x318] sm:$0xff] %v807_v35  ;;  %v935_v35 = vld [vmem:[%s1889_s12 + $0x918] sm:$0xff] }
  0x7e   : > { %810 = vst [vmem:[%s1894_s13 + $0x320] sm:$0xff] %v809_v36  ;;  %v937_v36 = vld [vmem:[%s1889_s12 + $0x920] sm:$0xff] }
  0x7f   : > { %812 = vst [vmem:[%s1894_s13 + $0x328] sm:$0xff] %v811_v37  ;;  %v939_v37 = vld [vmem:[%s1889_s12 + $0x928] sm:$0xff] }
  0x80   : > { %814 = vst [vmem:[%s1894_s13 + $0x330] sm:$0xff] %v813_v38  ;;  %v941_v38 = vld [vmem:[%s1889_s12 + $0x930] sm:$0xff] }
  0x81   : > { %816 = vst [vmem:[%s1894_s13 + $0x338] sm:$0xff] %v815_v39  ;;  %v943_v39 = vld [vmem:[%s1889_s12 + $0x938] sm:$0xff] }
  0x82   : > { %818 = vst [vmem:[%s1894_s13 + $0x340] sm:$0xff] %v817_v40  ;;  %v945_v40 = vld [vmem:[%s1889_s12 + $0x940] sm:$0xff] }
  0x83   : > { %820 = vst [vmem:[%s1894_s13 + $0x348] sm:$0xff] %v819_v41  ;;  %v947_v41 = vld [vmem:[%s1889_s12 + $0x948] sm:$0xff] }
  0x84   : > { %822 = vst [vmem:[%s1894_s13 + $0x350] sm:$0xff] %v821_v42  ;;  %v949_v42 = vld [vmem:[%s1889_s12 + $0x950] sm:$0xff] }
  0x85   : > { %824 = vst [vmem:[%s1894_s13 + $0x358] sm:$0xff] %v823_v43  ;;  %v951_v43 = vld [vmem:[%s1889_s12 + $0x958] sm:$0xff] }
  0x86   : > { %826 = vst [vmem:[%s1894_s13 + $0x360] sm:$0xff] %v825_v44  ;;  %v953_v44 = vld [vmem:[%s1889_s12 + $0x960] sm:$0xff] }
  0x87   : > { %828 = vst [vmem:[%s1894_s13 + $0x368] sm:$0xff] %v827_v45  ;;  %v955_v45 = vld [vmem:[%s1889_s12 + $0x968] sm:$0xff] }
  0x88   : > { %830 = vst [vmem:[%s1894_s13 + $0x370] sm:$0xff] %v829_v46  ;;  %v957_v46 = vld [vmem:[%s1889_s12 + $0x970] sm:$0xff] }
  0x89   : > { %832 = vst [vmem:[%s1894_s13 + $0x378] sm:$0xff] %v831_v47  ;;  %v959_v47 = vld [vmem:[%s1889_s12 + $0x978] sm:$0xff] }
  0x8a   : > { %834 = vst [vmem:[%s1894_s13 + $0x380] sm:$0xff] %v833_v48  ;;  %v961_v48 = vld [vmem:[%s1889_s12 + $0x980] sm:$0xff] }
  0x8b   : > { %836 = vst [vmem:[%s1894_s13 + $0x388] sm:$0xff] %v835_v49  ;;  %v963_v49 = vld [vmem:[%s1889_s12 + $0x988] sm:$0xff] }
  0x8c   : > { %838 = vst [vmem:[%s1894_s13 + $0x390] sm:$0xff] %v837_v50  ;;  %v965_v50 = vld [vmem:[%s1889_s12 + $0x990] sm:$0xff] }
  0x8d   : > { %840 = vst [vmem:[%s1894_s13 + $0x398] sm:$0xff] %v839_v51  ;;  %v967_v51 = vld [vmem:[%s1889_s12 + $0x998] sm:$0xff] }
  0x8e   : > { %842 = vst [vmem:[%s1894_s13 + $0x3a0] sm:$0xff] %v841_v52  ;;  %v969_v52 = vld [vmem:[%s1889_s12 + $0x9a0] sm:$0xff] }
  0x8f   : > { %844 = vst [vmem:[%s1894_s13 + $0x3a8] sm:$0xff] %v843_v53  ;;  %v971_v53 = vld [vmem:[%s1889_s12 + $0x9a8] sm:$0xff] }
  0x90   : > { %846 = vst [vmem:[%s1894_s13 + $0x3b0] sm:$0xff] %v845_v54  ;;  %v973_v54 = vld [vmem:[%s1889_s12 + $0x9b0] sm:$0xff] }
  0x91   : > { %848 = vst [vmem:[%s1894_s13 + $0x3b8] sm:$0xff] %v847_v55  ;;  %v975_v55 = vld [vmem:[%s1889_s12 + $0x9b8] sm:$0xff] }
  0x92   : > { %850 = vst [vmem:[%s1894_s13 + $0x3c0] sm:$0xff] %v849_v56  ;;  %v977_v56 = vld [vmem:[%s1889_s12 + $0x9c0] sm:$0xff] }
  0x93   : > { %852 = vst [vmem:[%s1894_s13 + $0x3c8] sm:$0xff] %v851_v57  ;;  %v979_v57 = vld [vmem:[%s1889_s12 + $0x9c8] sm:$0xff] }
  0x94   : > { %854 = vst [vmem:[%s1894_s13 + $0x3d0] sm:$0xff] %v853_v58  ;;  %v981_v58 = vld [vmem:[%s1889_s12 + $0x9d0] sm:$0xff] }
  0x95   : > { %856 = vst [vmem:[%s1894_s13 + $0x3d8] sm:$0xff] %v855_v59  ;;  %v983_v59 = vld [vmem:[%s1889_s12 + $0x9d8] sm:$0xff] }
  0x96   : > { %858 = vst [vmem:[%s1894_s13 + $0x3e0] sm:$0xff] %v857_v60  ;;  %v985_v60 = vld [vmem:[%s1889_s12 + $0x9e0] sm:$0xff] }
  0x97   : > { %860 = vst [vmem:[%s1894_s13 + $0x3e8] sm:$0xff] %v859_v61  ;;  %v987_v61 = vld [vmem:[%s1889_s12 + $0x9e8] sm:$0xff] }
  0x98   : > { %862 = vst [vmem:[%s1894_s13 + $0x3f0] sm:$0xff] %v861_v62  ;;  %v989_v62 = vld [vmem:[%s1889_s12 + $0x9f0] sm:$0xff] }
  0x99   : > { %864 = vst [vmem:[%s1894_s13 + $0x3f8] sm:$0xff] %v863_v63  ;;  %v991_v63 = vld [vmem:[%s1889_s12 + $0x9f8] sm:$0xff] }
  0x9a   : > { %866 = vst [vmem:[%s1894_s13 + $0x400] sm:$0xff] %v865_v0 }
  0x9b   : > { %868 = vst [vmem:[%s1894_s13 + $0x408] sm:$0xff] %v867_v1 }
  0x9c   : > { %870 = vst [vmem:[%s1894_s13 + $0x410] sm:$0xff] %v869_v2 }
  0x9d   : > { %872 = vst [vmem:[%s1894_s13 + $0x418] sm:$0xff] %v871_v3 }
  0x9e   : > { %874 = vst [vmem:[%s1894_s13 + $0x420] sm:$0xff] %v873_v4 }
  0x9f   : > { %876 = vst [vmem:[%s1894_s13 + $0x428] sm:$0xff] %v875_v5 }
  0xa0   : > { %878 = vst [vmem:[%s1894_s13 + $0x430] sm:$0xff] %v877_v6 }
  0xa1   : > { %880 = vst [vmem:[%s1894_s13 + $0x438] sm:$0xff] %v879_v7 }
  0xa2   : > { %882 = vst [vmem:[%s1894_s13 + $0x440] sm:$0xff] %v881_v8 }
  0xa3   : > { %884 = vst [vmem:[%s1894_s13 + $0x448] sm:$0xff] %v883_v9 }
  0xa4   : > { %886 = vst [vmem:[%s1894_s13 + $0x450] sm:$0xff] %v885_v10 }
  0xa5   : > { %888 = vst [vmem:[%s1894_s13 + $0x458] sm:$0xff] %v887_v11 }
  0xa6   : > { %890 = vst [vmem:[%s1894_s13 + $0x460] sm:$0xff] %v889_v12 }
  0xa7   : > { %892 = vst [vmem:[%s1894_s13 + $0x468] sm:$0xff] %v891_v13 }
  0xa8   : > { %894 = vst [vmem:[%s1894_s13 + $0x470] sm:$0xff] %v893_v14 }
  0xa9   : > { %896 = vst [vmem:[%s1894_s13 + $0x478] sm:$0xff] %v895_v15 }
  0xaa   : > { %898 = vst [vmem:[%s1894_s13 + $0x480] sm:$0xff] %v897_v16 }
  0xab   : > { %900 = vst [vmem:[%s1894_s13 + $0x488] sm:$0xff] %v899_v17 }
  0xac   : > { %902 = vst [vmem:[%s1894_s13 + $0x490] sm:$0xff] %v901_v18 }
  0xad   : > { %904 = vst [vmem:[%s1894_s13 + $0x498] sm:$0xff] %v903_v19 }
  0xae   : > { %906 = vst [vmem:[%s1894_s13 + $0x4a0] sm:$0xff] %v905_v20 }
  0xaf   : > { %908 = vst [vmem:[%s1894_s13 + $0x4a8] sm:$0xff] %v907_v21 }
  0xb0   : > { %910 = vst [vmem:[%s1894_s13 + $0x4b0] sm:$0xff] %v909_v22 }
  0xb1   : > { %912 = vst [vmem:[%s1894_s13 + $0x4b8] sm:$0xff] %v911_v23 }
  0xb2   : > { %914 = vst [vmem:[%s1894_s13 + $0x4c0] sm:$0xff] %v913_v24 }
  0xb3   : > { %916 = vst [vmem:[%s1894_s13 + $0x4c8] sm:$0xff] %v915_v25 }
  0xb4   : > { %918 = vst [vmem:[%s1894_s13 + $0x4d0] sm:$0xff] %v917_v26 }
  0xb5   : > { %920 = vst [vmem:[%s1894_s13 + $0x4d8] sm:$0xff] %v919_v27 }
  0xb6   : > { %922 = vst [vmem:[%s1894_s13 + $0x4e0] sm:$0xff] %v921_v28 }
  0xb7   : > { %924 = vst [vmem:[%s1894_s13 + $0x4e8] sm:$0xff] %v923_v29 }
  0xb8   : > { %926 = vst [vmem:[%s1894_s13 + $0x4f0] sm:$0xff] %v925_v30 }
  0xb9   : > { %928 = vst [vmem:[%s1894_s13 + $0x4f8] sm:$0xff] %v927_v31 }
  0xba   : > { %930 = vst [vmem:[%s1894_s13 + $0x500] sm:$0xff] %v929_v32 }
  0xbb   : > { %932 = vst [vmem:[%s1894_s13 + $0x508] sm:$0xff] %v931_v33 }
  0xbc   : > { %934 = vst [vmem:[%s1894_s13 + $0x510] sm:$0xff] %v933_v34 }
  0xbd   : > { %936 = vst [vmem:[%s1894_s13 + $0x518] sm:$0xff] %v935_v35 }
  0xbe   : > { %938 = vst [vmem:[%s1894_s13 + $0x520] sm:$0xff] %v937_v36 }
  0xbf   : > { %940 = vst [vmem:[%s1894_s13 + $0x528] sm:$0xff] %v939_v37 }
  0xc0   : > { %942 = vst [vmem:[%s1894_s13 + $0x530] sm:$0xff] %v941_v38 }
  0xc1   : > { %944 = vst [vmem:[%s1894_s13 + $0x538] sm:$0xff] %v943_v39 }
  0xc2   : > { %946 = vst [vmem:[%s1894_s13 + $0x540] sm:$0xff] %v945_v40 }
  0xc3   : > { %948 = vst [vmem:[%s1894_s13 + $0x548] sm:$0xff] %v947_v41 }
  0xc4   : > { %950 = vst [vmem:[%s1894_s13 + $0x550] sm:$0xff] %v949_v42 }
  0xc5   : > { %952 = vst [vmem:[%s1894_s13 + $0x558] sm:$0xff] %v951_v43 }
  0xc6   : > { %954 = vst [vmem:[%s1894_s13 + $0x560] sm:$0xff] %v953_v44 }
  0xc7   : > { %956 = vst [vmem:[%s1894_s13 + $0x568] sm:$0xff] %v955_v45 }
  0xc8   : > { %958 = vst [vmem:[%s1894_s13 + $0x570] sm:$0xff] %v957_v46 }
  0xc9   : > { %960 = vst [vmem:[%s1894_s13 + $0x578] sm:$0xff] %v959_v47 }
  0xca   : > { %962 = vst [vmem:[%s1894_s13 + $0x580] sm:$0xff] %v961_v48 }
  0xcb   : > { %964 = vst [vmem:[%s1894_s13 + $0x588] sm:$0xff] %v963_v49 }
  0xcc   : > { %966 = vst [vmem:[%s1894_s13 + $0x590] sm:$0xff] %v965_v50 }
  0xcd   : > { %968 = vst [vmem:[%s1894_s13 + $0x598] sm:$0xff] %v967_v51 }
  0xce   : > { %970 = vst [vmem:[%s1894_s13 + $0x5a0] sm:$0xff] %v969_v52 }
  0xcf   : > { %972 = vst [vmem:[%s1894_s13 + $0x5a8] sm:$0xff] %v971_v53 }
  0xd0   : > { %974 = vst [vmem:[%s1894_s13 + $0x5b0] sm:$0xff] %v973_v54 }
  0xd1   : > { %976 = vst [vmem:[%s1894_s13 + $0x5b8] sm:$0xff] %v975_v55 }
  0xd2   : > { %978 = vst [vmem:[%s1894_s13 + $0x5c0] sm:$0xff] %v977_v56 }
  0xd3   : > { %980 = vst [vmem:[%s1894_s13 + $0x5c8] sm:$0xff] %v979_v57 }
  0xd4   : > { %982 = vst [vmem:[%s1894_s13 + $0x5d0] sm:$0xff] %v981_v58 }
  0xd5   : > { %984 = vst [vmem:[%s1894_s13 + $0x5d8] sm:$0xff] %v983_v59 }
  0xd6   : > { %986 = vst [vmem:[%s1894_s13 + $0x5e0] sm:$0xff] %v985_v60 }
  0xd7   : > { %988 = vst [vmem:[%s1894_s13 + $0x5e8] sm:$0xff] %v987_v61 }
  0xd8   : > { %990 = vst [vmem:[%s1894_s13 + $0x5f0] sm:$0xff] %v989_v62 }
  0xd9   : > { %992 = vst [vmem:[%s1894_s13 + $0x5f8] sm:$0xff] %v991_v63 }
  0xda PF: > { %p1583_p7 = scmp.ge.s32.totalorder %s1795_s23, 1  ;;  %p997_p8 = scmp.lt.s32.totalorder %s1795_s23, 5 }
  0xdc   : > { %p998_p9 = pnand %p1583_p7, %p997_p8 }
  0xdd   : > { %s1004_s14 = sand.u32 (!%p998_p9), 1, %s1771_s17   ;;  %s1584_s15 = sshll.u32 (!%p998_p9), %s1779_s19, 6 }
  0xde   : > { %1001 = sbr.rel (%p998_p9) target bundleno = 468 (0x1d4), region = 70  ;;  %p1043_p10 = scmp.lt.s32.totalorder (!%p998_p9), %s1783_s20, 1 }
  0xdf   : > { %s2291_s28 = smul.u32 (!%p998_p9), 1536, %s1004_s14  ;;  %p1045_p11 = scmp.lt.s32.totalorder (!%p998_p9), %s1584_s15, 127 }
  0xe0   : > { %s1587_s30 = sshll.u32 (!%p998_p9), %s1779_s19, 2  ;;  %s2296_s6 = sld [smem:[#allocation2]] (!%p998_p9) }
  0xe1   : > { %p1056_p12 = scmp.lt.s32.totalorder (!%p998_p9), %s1587_s30, 7  ;;  %s1006_s25 = scalar_lea.vmem (!%p998_p9), [#allocation3], %s2291_s28 }
  0xe2   : > { %s2309_s26 = smov (!%p998_p9), 0  }
  0xe3   : > { %v2284_v0 = vld [vmem:[%s2491_s2] sm:$0x1]  ;;  %v2289_v1 = vld [vmem:[%s2491_s2 + $0x1] sm:$0x1]  ;;  %s2507_s20 = smov (!%p1043_p10, %s1783_s20), 1  ;;  %s2509_s15 = smov (!%p1045_p11, %s1584_s15), 127 }
  0xe4   : > { %s1585_s17 = sshll.u32 %s2507_s20, 7  ;;  %s1588_s11 = sshll.u32 %s2507_s20, 3 }
  0xe5   : > { %s1048_s5 = sadd.s32 %s1585_s17, %s2509_s15  ;;  %s2511_s30 = smov (!%p1056_p12, %s1587_s30), 7 }
  0xe6   : > { %s1586_s7 = sshll.u32 %s1048_s5, 3  ;;  %s1059_s12 = sadd.s32 %s1588_s11, %s2511_s30 }
  0xe7   : > { %s2301_s10 = scalar_lea.vmem %s2489_s0, %s1586_s7  ;;  %s1589_s13 = sshll.u32 %s1059_s12, 2 }
  0xe8   : > { %s2306_s19 = scalar_lea.vmem %s2493_s4, %s1589_s13 }
  0xe9 LB: >> { %s2315_s20 = sshll.u32 %s1799_s26, 7  ;;  %vm1090_vm0 = vcmask 261120   ;;  %s1071_s26 = sadd.s32 1, %s1799_s26   ;;  %s1799_s26 = sphi %s2309_s26, %s1071_s26  }
  0xea   : >> { %s2320_s15 = scalar_lea.vmem %s1006_s25, %s2315_s20 [#allocation3]  ;;  %s2324_s27 = scalar_lea.vmem %s2301_s10, %s2315_s20 }
  0xeb   : >> { %v1194_v2 = vld [vmem:[%s2320_s15 + $0x278] sm:$0xff]  ;;  %v1193_v6 = vld [vmem:[%s2320_s15 + $0x270] sm:$0xff]  ;;  %v1192_v10 = vld [vmem:[%s2320_s15 + $0x268] sm:$0xff]  ;;  %s1446_s30 = sshra.s32 %s2315_s20, 7  ;;  %p1068_p13 = scmp.ge.s32.totalorder %s1071_s26, 4  }
  0xec   : >> { %v1210_v3 = vld [vmem:[%s2320_s15 + $0x478] sm:$0xff]  ;;  %1625 = vmatpush.xpose.msk.msra.mxu2 %vm1090_vm0, %v1194_v2  ;;  %v1209_v7 = vld [vmem:[%s2320_s15 + $0x470] sm:$0xff]  ;;  %v1208_v11 = vld [vmem:[%s2320_s15 + $0x468] sm:$0xff]  ;;  %s1659_s17 = sshll.u32 %s1446_s30, 2 }
  0xed   : >> { %v1089_v4 = vld [vmem:[%s2324_s27 + $0x78] sm:$0xff]  ;;  %1642 = vmatpush.xpose.msk.msra.mxu3 %vm1090_vm0, %v1210_v3  ;;  %v1088_v8 = vld [vmem:[%s2324_s27 + $0x70] sm:$0xff]  ;;  %v1087_v12 = vld [vmem:[%s2324_s27 + $0x68] sm:$0xff]  ;;  %s1449_s5 = scalar_lea.vmem %s2306_s19, %s1659_s17 }
  0xee   : >> { %v1178_v5 = vld [vmem:[%s2320_s15 + $0x78] sm:$0xff]  ;;  %1591 = vmatpush.xpose.msk.msra.mxu0 %vm1090_vm0, %v1089_v4  ;;  %v1177_v9 = vld [vmem:[%s2320_s15 + $0x70] sm:$0xff]  ;;  %v1176_v13 = vld [vmem:[%s2320_s15 + $0x68] sm:$0xff] }
  0xef   : >> { %1608 = vmatpush.xpose.msk.msra.mxu1 %vm1090_vm0, %v1178_v5  ;;  %v1191_v14 = vld [vmem:[%s2320_s15 + $0x260] sm:$0xff]  ;;  %v1190_v18 = vld [vmem:[%s2320_s15 + $0x258] sm:$0xff]  ;;  %v1189_v22 = vld [vmem:[%s2320_s15 + $0x250] sm:$0xff] }
  0xf0   : >> { %1626 = vmatpush.xpose.msk.msra.mxu2 %vm1090_vm0, %v1193_v6  ;;  %v1207_v15 = vld [vmem:[%s2320_s15 + $0x460] sm:$0xff]  ;;  %v1206_v19 = vld [vmem:[%s2320_s15 + $0x458] sm:$0xff]  ;;  %v1205_v23 = vld [vmem:[%s2320_s15 + $0x450] sm:$0xff] }
  0xf1   : >> { %1643 = vmatpush.xpose.msk.msra.mxu3 %vm1090_vm0, %v1209_v7  ;;  %v1086_v16 = vld [vmem:[%s2324_s27 + $0x60] sm:$0xff]  ;;  %v1085_v20 = vld [vmem:[%s2324_s27 + $0x58] sm:$0xff]  ;;  %v1084_v24 = vld [vmem:[%s2324_s27 + $0x50] sm:$0xff]  ;;  %v1422_v7 = vstv %s2296_s6 }
  0xf2   : >> { %1592 = vmatpush.xpose.msk.msra.mxu0 %vm1090_vm0, %v1088_v8  ;;  %v1175_v17 = vld [vmem:[%s2320_s15 + $0x60] sm:$0xff]  ;;  %v1174_v21 = vld [vmem:[%s2320_s15 + $0x58] sm:$0xff]  ;;  %v1173_v25 = vld [vmem:[%s2320_s15 + $0x50] sm:$0xff] }
  0xf3   : >> { %1609 = vmatpush.xpose.msk.msra.mxu1 %vm1090_vm0, %v1177_v9  ;;  %v1188_v26 = vld [vmem:[%s2320_s15 + $0x248] sm:$0xff]  ;;  %v1187_v30 = vld [vmem:[%s2320_s15 + $0x240] sm:$0xff]  ;;  %v1186_v34 = vld [vmem:[%s2320_s15 + $0x238] sm:$0xff] }
  0xf4   : >> { %1627 = vmatpush.xpose.msk.msra.mxu2 %vm1090_vm0, %v1192_v10  ;;  %v1204_v27 = vld [vmem:[%s2320_s15 + $0x448] sm:$0xff]  ;;  %v1203_v31 = vld [vmem:[%s2320_s15 + $0x440] sm:$0xff]  ;;  %v1202_v35 = vld [vmem:[%s2320_s15 + $0x438] sm:$0xff] }
  0xf5   : >> { %1644 = vmatpush.xpose.msk.msra.mxu3 %vm1090_vm0, %v1208_v11  ;;  %v1083_v28 = vld [vmem:[%s2324_s27 + $0x48] sm:$0xff]  ;;  %v1082_v32 = vld [vmem:[%s2324_s27 + $0x40] sm:$0xff]  ;;  %v1081_v36 = vld [vmem:[%s2324_s27 + $0x38] sm:$0xff] }
  0xf6   : >> { %1593 = vmatpush.xpose.msk.msra.mxu0 %vm1090_vm0, %v1087_v12  ;;  %v1172_v29 = vld [vmem:[%s2320_s15 + $0x48] sm:$0xff]  ;;  %v1171_v33 = vld [vmem:[%s2320_s15 + $0x40] sm:$0xff]  ;;  %v1170_v37 = vld [vmem:[%s2320_s15 + $0x38] sm:$0xff] }
  0xf7   : >> { %1610 = vmatpush.xpose.msk.msra.mxu1 %vm1090_vm0, %v1176_v13  ;;  %v1185_v38 = vld [vmem:[%s2320_s15 + $0x230] sm:$0xff]  ;;  %v1184_v42 = vld [vmem:[%s2320_s15 + $0x228] sm:$0xff]  ;;  %v1183_v46 = vld [vmem:[%s2320_s15 + $0x220] sm:$0xff] }
  0xf8   : >> { %1628 = vmatpush.xpose.msk.msra.mxu2 %vm1090_vm0, %v1191_v14  ;;  %v1201_v39 = vld [vmem:[%s2320_s15 + $0x430] sm:$0xff]  ;;  %v1200_v43 = vld [vmem:[%s2320_s15 + $0x428] sm:$0xff]  ;;  %v1199_v47 = vld [vmem:[%s2320_s15 + $0x420] sm:$0xff] }
  0xf9   : >> { %1645 = vmatpush.xpose.msk.msra.mxu3 %vm1090_vm0, %v1207_v15  ;;  %v1080_v40 = vld [vmem:[%s2324_s27 + $0x30] sm:$0xff]  ;;  %v1079_v44 = vld [vmem:[%s2324_s27 + $0x28] sm:$0xff]  ;;  %v1078_v48 = vld [vmem:[%s2324_s27 + $0x20] sm:$0xff] }
  0xfa   : >> { %1594 = vmatpush.xpose.msk.msra.mxu0 %vm1090_vm0, %v1086_v16  ;;  %v1169_v41 = vld [vmem:[%s2320_s15 + $0x30] sm:$0xff]  ;;  %v1168_v45 = vld [vmem:[%s2320_s15 + $0x28] sm:$0xff]  ;;  %v1167_v49 = vld [vmem:[%s2320_s15 + $0x20] sm:$0xff] }
  0xfb   : >> { %1611 = vmatpush.xpose.msk.msra.mxu1 %vm1090_vm0, %v1175_v17  ;;  %v1182_v50 = vld [vmem:[%s2320_s15 + $0x218] sm:$0xff]  ;;  %v1181_v54 = vld [vmem:[%s2320_s15 + $0x210] sm:$0xff]  ;;  %v1180_v58 = vld [vmem:[%s2320_s15 + $0x208] sm:$0xff] }
  0xfc   : >> { %1629 = vmatpush.xpose.msk.msra.mxu2 %vm1090_vm0, %v1190_v18  ;;  %v1198_v51 = vld [vmem:[%s2320_s15 + $0x418] sm:$0xff]  ;;  %v1197_v55 = vld [vmem:[%s2320_s15 + $0x410] sm:$0xff]  ;;  %v1196_v59 = vld [vmem:[%s2320_s15 + $0x408] sm:$0xff] }
  0xfd   : >> { %1646 = vmatpush.xpose.msk.msra.mxu3 %vm1090_vm0, %v1206_v19  ;;  %v1077_v52 = vld [vmem:[%s2324_s27 + $0x18] sm:$0xff]  ;;  %v1076_v56 = vld [vmem:[%s2324_s27 + $0x10] sm:$0xff]  ;;  %v1075_v60 = vld [vmem:[%s2324_s27 + $0x8] sm:$0xff] }
  0xfe   : >> { %1595 = vmatpush.xpose.msk.msra.mxu0 %vm1090_vm0, %v1085_v20  ;;  %v1166_v53 = vld [vmem:[%s2320_s15 + $0x18] sm:$0xff]  ;;  %v1165_v57 = vld [vmem:[%s2320_s15 + $0x10] sm:$0xff]  ;;  %v1164_v61 = vld [vmem:[%s2320_s15 + $0x8] sm:$0xff] }
  0xff   : >> { %1612 = vmatpush.xpose.msk.msra.mxu1 %vm1090_vm0, %v1174_v21  ;;  %v1179_v62 = vld [vmem:[%s2320_s15 + $0x200] sm:$0xff] }
 0x100   : >> { %1630 = vmatpush.xpose.msk.msra.mxu2 %vm1090_vm0, %v1189_v22  ;;  %v1195_v63 = vld [vmem:[%s2320_s15 + $0x400] sm:$0xff] }
 0x101   : >> { %1647 = vmatpush.xpose.msk.msra.mxu3 %vm1090_vm0, %v1205_v23  ;;  %v1074_v2 = vld [vmem:[%s2324_s27] sm:$0xff] }
 0x102   : >> { %1596 = vmatpush.xpose.msk.msra.mxu0 %vm1090_vm0, %v1084_v24  ;;  %v1163_v3 = vld [vmem:[%s2320_s15] sm:$0xff] }
 0x103   : >> { %1613 = vmatpush.xpose.msk.msra.mxu1 %vm1090_vm0, %v1173_v25 }
 0x104   : >> { %1631 = vmatpush.xpose.msk.msra.mxu2 %vm1090_vm0, %v1188_v26 }
 0x105   : >> { %1648 = vmatpush.xpose.msk.msra.mxu3 %vm1090_vm0, %v1204_v27 }
 0x106   : >> { %1597 = vmatpush.xpose.msk.msra.mxu0 %vm1090_vm0, %v1083_v28 }
 0x107   : >> { %1614 = vmatpush.xpose.msk.msra.mxu1 %vm1090_vm0, %v1172_v29 }
 0x108   : >> { %1632 = vmatpush.xpose.msk.msra.mxu2 %vm1090_vm0, %v1187_v30 }
 0x109   : >> { %1649 = vmatpush.xpose.msk.msra.mxu3 %vm1090_vm0, %v1203_v31 }
 0x10a   : >> { %1598 = vmatpush.xpose.msk.msra.mxu0 %vm1090_vm0, %v1082_v32 }
 0x10b   : >> { %1615 = vmatpush.xpose.msk.msra.mxu1 %vm1090_vm0, %v1171_v33 }
 0x10c   : >> { %1633 = vmatpush.xpose.msk.msra.mxu2 %vm1090_vm0, %v1186_v34 }
 0x10d   : >> { %1650 = vmatpush.xpose.msk.msra.mxu3 %vm1090_vm0, %v1202_v35 }
 0x10e   : >> { %1599 = vmatpush.xpose.msk.msra.mxu0 %vm1090_vm0, %v1081_v36 }
 0x10f   : >> { %1616 = vmatpush.xpose.msk.msra.mxu1 %vm1090_vm0, %v1170_v37 }
 0x110   : >> { %1634 = vmatpush.xpose.msk.msra.mxu2 %vm1090_vm0, %v1185_v38 }
 0x111   : >> { %1651 = vmatpush.xpose.msk.msra.mxu3 %vm1090_vm0, %v1201_v39 }
 0x112   : >> { %1600 = vmatpush.xpose.msk.msra.mxu0 %vm1090_vm0, %v1080_v40 }
 0x113   : >> { %1617 = vmatpush.xpose.msk.msra.mxu1 %vm1090_vm0, %v1169_v41 }
 0x114   : >> { %1635 = vmatpush.xpose.msk.msra.mxu2 %vm1090_vm0, %v1184_v42 }
 0x115   : >> { %1652 = vmatpush.xpose.msk.msra.mxu3 %vm1090_vm0, %v1200_v43 }
 0x116   : >> { %1601 = vmatpush.xpose.msk.msra.mxu0 %vm1090_vm0, %v1079_v44 }
 0x117   : >> { %1618 = vmatpush.xpose.msk.msra.mxu1 %vm1090_vm0, %v1168_v45 }
 0x118   : >> { %1636 = vmatpush.xpose.msk.msra.mxu2 %vm1090_vm0, %v1183_v46 }
 0x119   : >> { %1653 = vmatpush.xpose.msk.msra.mxu3 %vm1090_vm0, %v1199_v47 }
 0x11a   : >> { %1602 = vmatpush.xpose.msk.msra.mxu0 %vm1090_vm0, %v1078_v48 }
 0x11b   : >> { %1619 = vmatpush.xpose.msk.msra.mxu1 %vm1090_vm0, %v1167_v49 }
 0x11c   : >> { %1637 = vmatpush.xpose.msk.msra.mxu2 %vm1090_vm0, %v1182_v50 }
 0x11d   : >> { %1654 = vmatpush.xpose.msk.msra.mxu3 %vm1090_vm0, %v1198_v51 }
 0x11e   : >> { %1603 = vmatpush.xpose.msk.msra.mxu0 %vm1090_vm0, %v1077_v52 }
 0x11f   : >> { %1620 = vmatpush.xpose.msk.msra.mxu1 %vm1090_vm0, %v1166_v53 }
 0x120   : >> { %1638 = vmatpush.xpose.msk.msra.mxu2 %vm1090_vm0, %v1181_v54 }
 0x121   : >> { %1655 = vmatpush.xpose.msk.msra.mxu3 %vm1090_vm0, %v1197_v55 }
 0x122   : >> { %1604 = vmatpush.xpose.msk.msra.mxu0 %vm1090_vm0, %v1076_v56 }
 0x123   : >> { %1621 = vmatpush.xpose.msk.msra.mxu1 %vm1090_vm0, %v1165_v57 }
 0x124   : >> { %1639 = vmatpush.xpose.msk.msra.mxu2 %vm1090_vm0, %v1180_v58 }
 0x125   : >> { %1656 = vmatpush.xpose.msk.msra.mxu3 %vm1090_vm0, %v1196_v59 }
 0x126   : >> { %1605 = vmatpush.xpose.msk.msra.mxu0 %vm1090_vm0, %v1075_v60 }
 0x127   : >> { %1622 = vmatpush.xpose.msk.msra.mxu1 %vm1090_vm0, %v1164_v61 }
 0x128   : >> { %1640 = vmatpush.xpose.msk.msra.mxu2 %vm1090_vm0, %v1179_v62 }
 0x129   : >> { %1657 = vmatpush.xpose.msk.msra.mxu3 %vm1090_vm0, %v1195_v63 }
 0x12a   : >> { %1606 = vmatpush.xpose.msk.msra.mxu0 %vm1090_vm0, %v1074_v2 }
 0x12b   : >> { %1623 = vmatpush.xpose.msk.msra.mxu1 %vm1090_vm0, %v1163_v3  ;;  %1641 = vmatmul.msk.f32.vlgmr.msra.gmra.mxu2 %vm1090_vm0, %v2289_v1 }
 0x12c   : >> { %1658 = vmatmul.msk.f32.vlgmr.msra.gmra.mxu3 %vm1090_vm0, %v2289_v1 }
 0x12d   : >> { %1607 = vmatmul.msk.f32.vlgmr.msra.gmra.mxu0 %vm1090_vm0, %v2284_v0 }
 0x12e   : >> { %1624 = vmatmul.msk.f32.vlgmr.msra.gmra.mxu1 %vm1090_vm0, %v2289_v1 }
 0x1aa   : >> { %v1159_v4 = vpop.f32.mrf.mxu0 }
 0x1ab   : >> { %v1375_v5 = vpop.f32.mrf.mxu1 }
 0x1ac   : >> { %v1418_v6 = vadd.f32 %v1375_v5, %v1159_v4 }
 0x1ae   : >> { %v1395_v8 = vpop.f32.mrf.mxu2  ;;  %v1423_v10 = vmul.f32 %v1422_v7, %v1418_v6  ;;  %vm1421_vm1 = vcmp.ge.f32.partialorder %v1418_v6, 0.0 }
 0x1af   : >> { %v1415_v9 = vpop.f32.mrf.mxu3  ;;  %v1419_v11 = vadd.f32 %v1395_v8, %v1159_v4 }
 0x1b0   : >> { %v1420_v12 = vadd.f32 %v1415_v9, %v1159_v4  ;;  %v1424_v15 = vsel %vm1421_vm1, %v1418_v6, %v1423_v10 }
 0x1b1   : >> { %vm1425_vm2 = vcmp.ge.f32.partialorder %v1419_v11, 0.0  ;;  %v1426_v13 = vmul.f32 %v1422_v7, %v1419_v11 }
 0x1b2   : >> { %v1429_v14 = vmul.f32 %v1422_v7, %v1420_v12  ;;  %vm1428_vm3 = vcmp.ge.f32.partialorder %v1420_v12, 0.0 }
 0x1b3   : >> { %v1427_v16 = vsel %vm1425_vm2, %v1419_v11, %v1426_v13 }
 0x1b4   : >> { %v1431_v17 = vmax.f32 %v1424_v15, %v1427_v16  ;;  %v1430_v18 = vsel %vm1428_vm3, %v1420_v12, %v1429_v14 }
 0x1b6   : >> { %v1432_v19 = vmax.f32 %v1431_v17, %v1430_v18 }
 0x1b8   : >> { %v1433_v20 = vsub.f32 %v1424_v15, %v1432_v19  ;;  %v1436_v21 = vsub.f32 %v1427_v16, %v1432_v19  ;;  %v1439_v22 = vsub.f32 %v1430_v18, %v1432_v19 }
 0x1ba   : >> { %v1434_v23 = vmul.f32 1.442695, %v1433_v20  ;;  %v1437_v24 = vmul.f32 1.442695, %v1436_v21  ;;  %v1440_v25 = vmul.f32 1.442695, %v1439_v22 }
 0x1bc   : >> { %1729 = vpow2.f32 %v1434_v23 }
 0x1bd   : >> { %1731 = vpow2.f32 %v1437_v24 }
 0x1be   : >> { %1733 = vpow2.f32 %v1440_v25 }
 0x1c2   : >> { %v1730_v26 = vpop.eup %1729 }
 0x1c3   : >> { %v1732_v27 = vpop.eup %1731 }
 0x1c4   : >> { %v1442_v28 = vadd.f32 %v1732_v27, %v1730_v26  ;;  %v1734_v29 = vpop.eup %1733 }
 0x1c6   : >> { %v1443_v30 = vadd.f32 %v1734_v29, %v1442_v28 }
 0x1c8   : >> { %1735 = vrcp.f32 %v1443_v30 }
 0x1ce   : >> { %v1736_v31 = vpop.eup %1735 }
 0x1cf   : >> { %v1445_v32 = vmul.f32 %v1736_v31, %v1730_v26  ;;  %v1451_v33 = vmul.f32 %v1736_v31, %v1732_v27  ;;  %v1453_v34 = vmul.f32 %v1736_v31, %v1734_v29  ;;  %1070 = sbr.rel (!%p1068_p13) target bundleno = 233 (0xe9), region = 122 }
 0x1d1   : >> { %1450 = vst [vmem:[%s1449_s5] sm:$0x1] %v1445_v32 }
 0x1d2   : >> { %1452 = vst [vmem:[%s1449_s5 + $0x1] sm:$0x1] %v1451_v33 }
 0x1d3   : >> { %1454 = vst [vmem:[%s1449_s5 + $0x2] sm:$0x1] %v1453_v34 }
 0x1d4 PF: > { %s15_s23 = sadd.s32 1, %s1795_s23   ;;  %s2494_s17 = smov %s1775_s18 }
 0x1d5   : > { %p12_p0 = scmp.ge.s32.totalorder %s15_s23, 6   ;;  %s2495_s18 = smov %s1880_s29 }
 0x1d6   : > { %s2496_s19 = smov %s1787_s21  ;;  %s2497_s20 = smov %s1791_s22 }
 0x1d7   : > { %s2498_s21 = smov %s2501_s3  ;;  %s2499_s22 = smov %s2505_s24 }
 0x1d8   :  { %14 = sbr.rel (!%p12_p0) target bundleno = 6 (0x6), region = 133 }

</bundles_post_ra>
